<compile_context>
chip_gen: v5e
topology: v5e:2x2
jax: 0.10.0
libtpu: 0.0.40
codegen_flags: <defaults>
</compile_context>

<pallas_src>
import jax
import jax.numpy as jnp
from jax.experimental import pallas as pl
from jax.experimental.pallas import tpu as pltpu


def _choose_by_height_kernel(thresh_ref, boxes_ref, first_ref, second_ref):
    # thresh_ref: (1, 1) float32 in SMEM.
    # boxes_ref:  (N, 4) in VMEM, columns (x1, y1, x2, y2) — original layout,
    #             no transpose required upstream.
    y1 = boxes_ref[:, 1:2].astype(jnp.float32)           # (N, 1)
    y2 = boxes_ref[:, 3:4].astype(jnp.float32)           # (N, 1)
    heights = y2 - y1                                     # (N, 1) f32

    first = heights < thresh_ref[0, 0]                    # (N, 1) bool; NaN -> False
    first_i32 = first.astype(jnp.int32)                   # i1 -> i32 -> i8 (robust lowering)
    first_ref[...] = first_i32.astype(jnp.int8)
    second_ref[...] = (1 - first_i32).astype(jnp.int8)    # ~first (NaN -> True)


def choose_by_height(boxes: jax.Array, height_thresh=250.0):
    """JAX/Pallas equivalent of ChooseByHeight.forward.

    Args:
      boxes: array of shape (N, 4), columns (x1, y1, x2, y2). Any float dtype.
      height_thresh: scalar threshold (Python float or 0-d array; runtime
        value — does not trigger a recompile when it changes).

    Returns:
      [first_map_indices, second_map_indices]: two bool arrays of shape (N,).
    """
    n = boxes.shape[0]
    thresh = jnp.asarray(height_thresh, dtype=jnp.float32).reshape(1, 1)

    # Single full-array block: one input DMA (16N B), two tiny int8 writebacks
    # (N B each).  See TODO(synk) above for the gridded large-N path.
    first_i8, second_i8 = pl.pallas_call(
        _choose_by_height_kernel,
        out_shape=(
            jax.ShapeDtypeStruct((n, 1), jnp.int8),
            jax.ShapeDtypeStruct((n, 1), jnp.int8),
        ),
        in_specs=[
            pl.BlockSpec(memory_space=pltpu.MemorySpace.SMEM),   # threshold scalar
            pl.BlockSpec(memory_space=pltpu.MemorySpace.VMEM),   # boxes (N, 4)
        ],
        out_specs=(
            pl.BlockSpec(memory_space=pltpu.MemorySpace.VMEM),
            pl.BlockSpec(memory_space=pltpu.MemorySpace.VMEM),
        ),
    )(thresh, boxes)

    # Glue is just a reshape + 0/1 -> bool cast (no extra logical_not pass).
    first = first_i8.reshape(n).astype(jnp.bool_)
    second = second_i8.reshape(n).astype(jnp.bool_)
    return [first, second]


if __name__ == "__main__":
    key = jax.random.PRNGKey(0)
    k1, k2, k3, k4 = jax.random.split(key, 4)

    N = 16
    height_thresh = 250.0

    # Deterministic synthetic boxes: (x1, y1, x2, y2) with heights spanning
    # both sides of the threshold.
    x1 = jax.random.uniform(k1, (N,), minval=0.0, maxval=512.0)
    y1 = jax.random.uniform(k2, (N,), minval=0.0, maxval=256.0)
    w = jax.random.uniform(k3, (N,), minval=1.0, maxval=128.0)
    h = jax.random.uniform(k4, (N,), minval=1.0, maxval=500.0)
    boxes = jnp.stack([x1, y1, x1 + w, y1 + h], axis=1).astype(jnp.float32)

    first, second = choose_by_height(boxes, height_thresh)
    jax.block_until_ready(first)
    jax.block_until_ready(second)

    # Pure-JAX reference check.
    heights_ref = boxes[:, 3] - boxes[:, 1]
    first_ref = heights_ref < height_thresh
    second_ref = ~first_ref

    assert first.dtype == jnp.bool_ and second.dtype == jnp.bool_
    assert first.shape == (N,) and second.shape == (N,)
    assert bool(jnp.all(first == first_ref))
    assert bool(jnp.all(second == second_ref))
    assert bool(jnp.all(first ^ second))  # exact complements

    print("KERNEL_OK")
</pallas_src>

<mosaic_0001>
module attributes {stable_mosaic.version = 11 : i64} {
  func.func @_choose_by_height_kernel(%arg0: memref<1x1xf32, #tpu.memory_space<smem>>, %arg1: memref<16x4xf32, #tpu.memory_space<vmem>>, %arg2: memref<16x1xi8, #tpu.memory_space<vmem>>, %arg3: memref<16x1xi8, #tpu.memory_space<vmem>>) attributes {dimension_semantics = [], scalar_prefetch = 0 : i64, scratch_operands = 0 : i64, tpu.core_type = #tpu.core_type<tc>} {
    %c0 = arith.constant 0 : index
    %c1 = arith.constant 1 : index
    %0 = vector.load %arg1[%c0, %c1] : memref<16x4xf32, #tpu.memory_space<vmem>>, vector<16x1xf32>
    %c0_0 = arith.constant 0 : index
    %c3 = arith.constant 3 : index
    %1 = vector.load %arg1[%c0_0, %c3] : memref<16x4xf32, #tpu.memory_space<vmem>>, vector<16x1xf32>
    %2 = arith.subf %1, %0 : vector<16x1xf32>
    %c0_1 = arith.constant 0 : index
    %c0_2 = arith.constant 0 : index
    %3 = memref.load %arg0[%c0_1, %c0_2] : memref<1x1xf32, #tpu.memory_space<smem>>
    %4 = vector.broadcast %3 : f32 to vector<16x1xf32>
    %5 = arith.cmpf olt, %2, %4 : vector<16x1xf32>
    %6 = arith.extui %5 : vector<16x1xi1> to vector<16x1xi32>
    %7 = arith.trunci %6 : vector<16x1xi32> to vector<16x1xi8>
    %c0_3 = arith.constant 0 : index
    %c0_4 = arith.constant 0 : index
    %8 = vector.load %arg2[%c0_3, %c0_4] : memref<16x1xi8, #tpu.memory_space<vmem>>, vector<16x1xi8>
    tpu.vector_store %arg2[%c0_3, %c0_4], %7 {strides = array<i32>} : memref<16x1xi8, #tpu.memory_space<vmem>>, vector<16x1xi8>,
    %c1_i32 = arith.constant 1 : i32
    %9 = vector.broadcast %c1_i32 : i32 to vector<16x1xi32>
    %10 = arith.subi %9, %6 : vector<16x1xi32>
    %11 = arith.trunci %10 : vector<16x1xi32> to vector<16x1xi8>
    %c0_5 = arith.constant 0 : index
    %c0_6 = arith.constant 0 : index
    %12 = vector.load %arg3[%c0_5, %c0_6] : memref<16x1xi8, #tpu.memory_space<vmem>>, vector<16x1xi8>
    tpu.vector_store %arg3[%c0_5, %c0_6], %11 {strides = array<i32>} : memref<16x1xi8, #tpu.memory_space<vmem>>, vector<16x1xi8>,
    return
  }
}

</mosaic_0001>

<bundles_post_ra>
// kernel: tpu_custom_call.1
= control target key start
LH: loop header
LB: loop body
LE: loop exit
PB: predicated region body
PF: predicated region fallthrough
CT: control target
= control target key end

     0   :  { %s86_s14 = smov 2   ;;  %v87_v6 = vmov 0   ;;  %vm60_vm6 = vcmask 1024   ;;  %s143_s1 = inlined_call_operand.vmem [shape: f32[16,4], index: 1, kind: input, shape index: {}]   ;;  %s144_s0 = inlined_call_operand.<no memory space> [shape: f32[1,1], index: 0, kind: input, shape index: {}]   ;;  %s145_s3 = inlined_call_operand.vmem [shape: s8[16,1], index: 3, kind: output, shape index: {1}]   ;;  %s146_s2 = inlined_call_operand.vmem [shape: s8[16,1], index: 2, kind: output, shape index: {0}]  }
   0x1   :  { %v16_v0 = vld [vmem:[%s143_s1] sm:$0xff]  ;;  %v17_v1 = vld [vmem:[%s143_s1 + $0x8] sm:$0xff]  ;;  %v29_v3 = vstv %s144_s0  ;;  %s88_s0 = smov 125  }
   0x2   :  { %20 = vrot.lane.b32.xlu0 %v16_v0, %s86_s14 }
   0xa   :  { %22 = vrot.lane.b32.xlu0 %v17_v1, %s86_s14 }
  0x74   :  { %v21_v2 = vpop.permute.xlu0 %20 }
  0x75   :  { %v26_v4 = vsub.f32 %v16_v0, %v21_v2 }
  0x77   :  { %vm118_vm0 = vcmp.lt.f32.partialorder %v26_v4, %v29_v3 }
  0x78   :  { %vm34_vm1 = vmpackc.low %vm118_vm0, %vm118_vm0  ;;  %v32_v21 = vsel %vm118_vm0, 1, %v87_v6 }
  0x79   :  { %v35_v7 = vsel %vm34_vm1, 16711935, %v87_v6  ;;  %v63_v23 = vsub.s32 1, %v32_v21 }
  0x7a   :  { %v37_v8 = vpack.c.b8 %v35_v7, %v35_v7 }
  0x7b   :  { %v65_v25 = vpack.c.b16 %v63_v23, %v63_v23 }
  0x7c   :  { %v23_v9 = vpop.permute.xlu0 %22  ;;  %vm38_vm4 = vnez %v37_v8 }
  0x7d   :  { %v27_v10 = vsub.f32 %v17_v1, %v23_v9  ;;  %v44_v16 = vsel %vm38_vm4, 16843009, %v87_v6  ;;  %v66_v26 = vpack.c.b8 %v65_v25, %v65_v25 }
  0x7e   :  { %v46_v19 = vunpack.c.0.s8 %v44_v16 }
  0x7f   :  { %vm31_vm2 = vcmp.lt.f32.partialorder %v27_v10, %v29_v3 }
  0x80   :  { %vm39_vm3 = vmpackc.low %vm31_vm2, %vm31_vm2  ;;  %v33_v11 = vsel %vm31_vm2, 1, %v87_v6 }
  0x81   :  { %v40_v12 = vsel %vm39_vm3, 16711935, %v87_v6  ;;  %v64_v13 = vsub.s32 1, %v33_v11 }
  0x82   :  { %v42_v14 = vpack.c.b8 %v40_v12, %v40_v12 }
  0x83   :  { %v67_v15 = vpack.c.b16 %v64_v13, %v64_v13 }
  0x84   :  { %vm43_vm5 = vnez %v42_v14 }
  0x85   :  { %v68_v17 = vpack.c.b8 %v67_v15, %v67_v15  ;;  %v45_v18 = vsel %vm43_vm5, 16843009, %v87_v6 }
  0x86   :  { %v47_v20 = vunpack.c.0.s8 %v45_v18 }
  0x87   :  { %71 = vrot.lane.b32.xlu2 %v68_v17, %s88_s0 }
  0x88   :  { %v48_v22 = vpack.c.b16 %v47_v20, %v46_v19 }
  0x8a   :  { %v49_v24 = vpack.c.b8 %v48_v22, %v48_v22 }
  0x8c   :  { %50 = vrot.lane.b32.xlu1 %v49_v24, %s88_s0 }
  0x94   :  { %69 = vrot.lane.b32.xlu1 %v66_v26, %s88_s0 }
  0xe1   :  { %v72_v27 = vpop.permute.xlu2 %71 }
  0xe2   :  { %74 = vst.msk [vmem:[%s145_s3 + $0x2] sm:$0x3] %vm60_vm6, %v72_v27 }
  0xfe   :  { %v51_v28 = vpop.permute.xlu1 %50 }
  0xff   :  { %vm52_vm7 = vnez %v51_v28 }
 0x100   :  { %v53_v29 = vsel %vm52_vm7, 16843009, %v87_v6 }
 0x101   :  { %v54_v30 = vunpack.c.0.s8 %v53_v29  ;;  %v55_v31 = vunpack.c.1.s8 %v53_v29 }
 0x103   :  { %v56_v32 = vpack.c.b16 %v54_v30, %v54_v30  ;;  %v58_v33 = vpack.c.b16 %v55_v31, %v55_v31 }
 0x105   :  { %v57_v34 = vpack.c.b8 %v56_v32, %v56_v32  ;;  %v59_v35 = vpack.c.b8 %v58_v33, %v58_v33 }
 0x106   :  { %v70_v36 = vpop.permute.xlu1 %69 }
 0x107   :  { %61 = vst.msk [vmem:[%s146_s2] sm:$0x3] %vm60_vm6, %v57_v34 }
 0x108   :  { %62 = vst.msk [vmem:[%s146_s2 + $0x2] sm:$0x3] %vm60_vm6, %v59_v35 }
 0x109   :  { %73 = vst.msk [vmem:[%s145_s3] sm:$0x3] %vm60_vm6, %v70_v36 }

</bundles_post_ra>
